<compile_context>
chip_gen: v6e
topology: v6e:2x2x1
jax: 0.10.0
libtpu: 0.0.40
codegen_flags: <defaults>
</compile_context>

<pallas_src>
from functools import partial

import jax
import jax.numpy as jnp
from jax.experimental import pallas as pl
from jax.experimental.pallas import tpu as pltpu


def _round_up(v, m):
    return (v + m - 1) // m * m


def _cdiv(a, b):
    return -(-a // b)


def _conv_gemm_kernel(w_ref, x_ref, b_ref, o_ref, patch_ref, *,
                      k, C, C_pad, Wp, L_out):
    # w_ref:     (O, k*k*C_pad)    tap-major flattened weights (zero cols c>=C)
    # x_ref:     (1, C, Lt)        flattened (row-major, width Wp) padded input
    #                              tile: output positions [t*L_out, t*L_out+L_out)
    #                              plus the (k-1)*(Wp+1) halo elements.
    # b_ref:     (O, 1)            bias (f32)
    # o_ref:     (1, O, L_out)     lane-dense output tile (L_out multiple of 128)
    # patch_ref: (k*k*C_pad, L_out) VMEM scratch: im2col built fully in VMEM.
    if C_pad != C:
        # Per-tap channel-padding rows have zero weight columns, but
        # uninitialized VMEM could hold NaNs (0*NaN=NaN) -> zero once per step.
        patch_ref[...] = jnp.zeros(patch_ref.shape, patch_ref.dtype)

    # Build the patch matrix with k*k contiguous lane-shifted copies (static
    # offsets, no reshapes / relayouts): patch[tap*C_pad + c, j] =
    #   x_flat[c, t*L_out + j + dy*Wp + dx]  ==  x_pad[c, h+dy, w+dx].
    for dy in range(k):
        for dx in range(k):
            tap = dy * k + dx
            off = dy * Wp + dx
            patch_ref[tap * C_pad:tap * C_pad + C, :] = \
                x_ref[0, :, off:off + L_out]

    # One fused MXU GEMM (contraction = k*k*C_pad), f32 accumulation + bias.
    acc = jnp.dot(w_ref[...], patch_ref[...],
                  preferred_element_type=jnp.float32)
    o_ref[0] = (acc + b_ref[...]).astype(o_ref.dtype)


def conv2d_same(x, weight, bias, kernel_size, *, compute_dtype=None,
                vmem_budget_bytes=24 << 20, vmem_limit_bytes=48 << 20):
    """Reflection-pad 'same' conv. x: (N,C,H,W); weight: (O,C,k,k); bias: (O,).

    compute_dtype: optional GEMM-operand dtype (jnp.bfloat16 is beneficial on
    v5e, v6e and v7x); accumulation, bias add and output stay f32.
    """
    N, C, H, W = x.shape
    O = weight.shape[0]
    k = kernel_size
    ka = k // 2
    kb = ka - 1 if k % 2 == 0 else ka

    out_dtype = x.dtype
    op_dtype = jnp.dtype(compute_dtype) if compute_dtype is not None else jnp.dtype(x.dtype)
    ob = op_dtype.itemsize
    out_b = jnp.dtype(out_dtype).itemsize

    # Cast BEFORE padding / layout plumbing so every HBM intermediate is narrow.
    xc = x.astype(op_dtype)

    # torch.nn.ReflectionPad2d((left=ka, right=kb, top=ka, bottom=kb))
    x_pad = jnp.pad(xc, ((0, 0), (0, 0), (ka, kb), (ka, kb)), mode="reflect")
    Hp, Wp = H + k - 1, W + k - 1

    # Fold batch into one channel-major flat spatial axis: (C, N*Hp*Wp).
    Lg = N * Hp * Wp
    x_flat = jnp.transpose(x_pad, (1, 0, 2, 3)).reshape(C, Lg)

    # Contraction-dim padding to the sublane multiple (8 for f32, 16 for bf16).
    sub = 8 * (4 // ob)
    C_pad = _round_up(C, sub)
    CKK = k * k * C_pad
    halo = (k - 1) * Wp + (k - 1)          # max tap offset into the tile

    # VMEM-budgeted lane tile.  Per-step footprint ~=
    #   2*C*Lt*ob (input, dbl-buf) + 2*O*L_out*out_b (output, dbl-buf)
    #   + CKK*L_out*ob (patch scratch) + 2*O*CKK*ob (weights) + slack.
    denom = 2 * C * ob + 2 * O * out_b + CKK * ob
    const = 2 * O * CKK * ob + 2 * C * _round_up(halo, 128) * ob + (64 << 10)
    L_out = max(128, (max(vmem_budget_bytes - const, 0) // denom) // 128 * 128)
    L_out = min(L_out, _round_up(Lg, 128))
    n_tiles = _cdiv(Lg, L_out)
    if n_tiles < 2 and Lg > 128:
        n_tiles = 2                         # keep both v7x TensorCores busy
    L_out = _round_up(_cdiv(Lg, n_tiles), 128)   # balance tiles, minimal waste
    n_tiles = _cdiv(Lg, L_out)
    Lt = _round_up(L_out + halo, 128)

    # Pad the flat input so every halo'd tile slice is in range, then cut tiles
    # (tiny (k-1)*(Wp+1) duplication per tile; XLA fuses pad+transpose+slices).
    pad_to = (n_tiles - 1) * L_out + Lt
    x_flat = jnp.pad(x_flat, ((0, 0), (0, pad_to - Lg)))
    x_tiles = jnp.stack(
        [x_flat[:, t * L_out: t * L_out + Lt] for t in range(n_tiles)], axis=0)

    # Tap-major flattened weights: column tap*C_pad + c <- weight[o, c, dy, dx].
    w_t = jnp.transpose(weight, (0, 2, 3, 1)).astype(op_dtype)      # (O,k,k,C)
    if C_pad != C:
        w_t = jnp.pad(w_t, ((0, 0), (0, 0), (0, 0), (0, C_pad - C)))
    w_flat = w_t.reshape(O, CKK)
    b2 = bias.reshape(O, 1).astype(jnp.float32)

    kernel = partial(_conv_gemm_kernel, k=k, C=C, C_pad=C_pad, Wp=Wp,
                     L_out=L_out)

    flops = 2 * N * O * C * k * k * H * W
    bytes_accessed = int(x_tiles.size * ob + w_flat.size * ob + b2.size * 4
                         + n_tiles * O * L_out * out_b)

    out_tiles = pl.pallas_call(
        kernel,
        out_shape=jax.ShapeDtypeStruct((n_tiles, O, L_out), out_dtype),
        grid=(n_tiles,),
        in_specs=[
            pl.BlockSpec((O, CKK), lambda t: (0, 0)),       # resident weights
            pl.BlockSpec((1, C, Lt), lambda t: (t, 0, 0)),  # halo'd input tile
            pl.BlockSpec((O, 1), lambda t: (0, 0)),         # resident bias
        ],
        out_specs=pl.BlockSpec((1, O, L_out), lambda t: (t, 0, 0)),
        scratch_shapes=[pltpu.VMEM((CKK, L_out), op_dtype)],
        compiler_params=pltpu.CompilerParams(
            dimension_semantics=("parallel",),
            vmem_limit_bytes=vmem_limit_bytes),
        cost_estimate=pl.CostEstimate(flops=flops, transcendentals=0,
                                      bytes_accessed=bytes_accessed),
    )(w_flat, x_tiles, b2)

    # Unpack: (n_tiles, O, L_out) -> (O, flat) -> (N, O, H, W).
    out_flat = jnp.transpose(out_tiles, (1, 0, 2)).reshape(O, n_tiles * L_out)
    out = out_flat[:, :Lg].reshape(O, N, Hp, Wp)[:, :, :H, :W]
    return jnp.transpose(out, (1, 0, 2, 3))


if __name__ == "__main__":
    # Small shapes consistent with the module's forward (NCHW input).
    N, C, O, H, W, K = 2, 4, 8, 16, 16, 3

    key = jax.random.PRNGKey(0)
    kx, kw, kb_ = jax.random.split(key, 3)

    x = jax.random.normal(kx, (N, C, H, W), dtype=jnp.float32)
    # Deterministic parameter init (PyTorch-like uniform bound 1/sqrt(fan_in)).
    fan_in = C * K * K
    bound = 1.0 / (fan_in ** 0.5)
    weight = jax.random.uniform(kw, (O, C, K, K), dtype=jnp.float32,
                                minval=-bound, maxval=bound)
    bias = jax.random.uniform(kb_, (O,), dtype=jnp.float32,
                              minval=-bound, maxval=bound)

    # Pure-JAX reference: reflect-pad + VALID cross-correlation (== torch Conv2d).
    ka = K // 2
    kb2 = ka - 1 if K % 2 == 0 else ka
    x_pad = jnp.pad(x, ((0, 0), (0, 0), (ka, kb2), (ka, kb2)), mode="reflect")
    ref = jax.lax.conv_general_dilated(
        x_pad, weight, window_strides=(1, 1), padding="VALID",
        dimension_numbers=("NCHW", "OIHW", "NCHW")) + bias.reshape(1, O, 1, 1)

    # f32 path (default) — tight check.
    out = conv2d_same(x, weight, bias, K)
    out = jax.block_until_ready(out)
    assert out.shape == (N, O, H, W)
    assert jnp.allclose(out, ref, atol=2e-4, rtol=2e-4), \
        float(jnp.max(jnp.abs(out - ref)))

    # bf16-operand path (beneficial on v5e/v6e/v7x), f32 accumulation — loose check.
    out_bf16 = conv2d_same(x, weight, bias, K, compute_dtype=jnp.bfloat16)
    out_bf16 = jax.block_until_ready(out_bf16)
    assert jnp.allclose(out_bf16, ref, atol=5e-2, rtol=5e-2), \
        float(jnp.max(jnp.abs(out_bf16 - ref)))

    print("KERNEL_OK")
</pallas_src>

<mosaic_0001>
module attributes {stable_mosaic.version = 11 : i64} {
  func.func @_conv_gemm_kernel(%arg0: i32, %arg1: memref<8x72xf32, #tpu.memory_space<vmem>>, %arg2: memref<1x4x512xf32, #tpu.memory_space<vmem>>, %arg3: memref<8x1xf32, #tpu.memory_space<vmem>>, %arg4: memref<1x8x384xf32, #tpu.memory_space<vmem>>, %arg5: memref<72x384xf32, #tpu.memory_space<vmem>>) attributes {dimension_semantics = [#tpu.dimension_semantics<parallel>], iteration_bounds = array<i64: 2>, scalar_prefetch = 0 : i64, scratch_operands = 1 : i64, tpu.core_type = #tpu.core_type<tc>, window_params = [{pipeline_mode = #tpu.pipeline_mode<synchronous>, transform_indices = @transform_0, window_bounds = array<i64: 8, 72>}, {transform_indices = @transform_1, window_bounds = array<i64: 1, 4, 512>}, {pipeline_mode = #tpu.pipeline_mode<synchronous>, transform_indices = @transform_2, window_bounds = array<i64: 8, 1>}, {transform_indices = @transform_3, window_bounds = array<i64: 1, 8, 384>}]} {
    %cst = arith.constant 0.000000e+00 : f32
    %0 = vector.broadcast %cst : f32 to vector<72x384xf32>
    %c0 = arith.constant 0 : index
    %c0_0 = arith.constant 0 : index
    %1 = vector.load %arg5[%c0, %c0_0] : memref<72x384xf32, #tpu.memory_space<vmem>>, vector<72x384xf32>
    tpu.vector_store %arg5[%c0, %c0_0], %0 {strides = array<i32>} : memref<72x384xf32, #tpu.memory_space<vmem>>, vector<72x384xf32>,
    %c0_1 = arith.constant 0 : index
    %c0_2 = arith.constant 0 : index
    %c0_3 = arith.constant 0 : index
    %2 = vector.load %arg2[%c0_1, %c0_2, %c0_3] : memref<1x4x512xf32, #tpu.memory_space<vmem>>, vector<1x4x384xf32>
    %3 = vector.shape_cast %2 : vector<1x4x384xf32> to vector<4x384xf32>
    %c0_4 = arith.constant 0 : index
    %c0_5 = arith.constant 0 : index
    %4 = vector.load %arg5[%c0_4, %c0_5] : memref<72x384xf32, #tpu.memory_space<vmem>>, vector<4x384xf32>
    tpu.vector_store %arg5[%c0_4, %c0_5], %3 {strides = array<i32>} : memref<72x384xf32, #tpu.memory_space<vmem>>, vector<4x384xf32>,
    %c0_6 = arith.constant 0 : index
    %c0_7 = arith.constant 0 : index
    %c1 = arith.constant 1 : index
    %5 = vector.load %arg2[%c0_6, %c0_7, %c1] : memref<1x4x512xf32, #tpu.memory_space<vmem>>, vector<1x4x384xf32>
    %6 = vector.shape_cast %5 : vector<1x4x384xf32> to vector<4x384xf32>
    %c8 = arith.constant 8 : index
    %c0_8 = arith.constant 0 : index
    %7 = vector.load %arg5[%c8, %c0_8] : memref<72x384xf32, #tpu.memory_space<vmem>>, vector<4x384xf32>
    tpu.vector_store %arg5[%c8, %c0_8], %6 {strides = array<i32>} : memref<72x384xf32, #tpu.memory_space<vmem>>, vector<4x384xf32>,
    %c0_9 = arith.constant 0 : index
    %c0_10 = arith.constant 0 : index
    %c2 = arith.constant 2 : index
    %8 = vector.load %arg2[%c0_9, %c0_10, %c2] : memref<1x4x512xf32, #tpu.memory_space<vmem>>, vector<1x4x384xf32>
    %9 = vector.shape_cast %8 : vector<1x4x384xf32> to vector<4x384xf32>
    %c16 = arith.constant 16 : index
    %c0_11 = arith.constant 0 : index
    %10 = vector.load %arg5[%c16, %c0_11] : memref<72x384xf32, #tpu.memory_space<vmem>>, vector<4x384xf32>
    tpu.vector_store %arg5[%c16, %c0_11], %9 {strides = array<i32>} : memref<72x384xf32, #tpu.memory_space<vmem>>, vector<4x384xf32>,
    %c0_12 = arith.constant 0 : index
    %c0_13 = arith.constant 0 : index
    %c18 = arith.constant 18 : index
    %11 = vector.load %arg2[%c0_12, %c0_13, %c18] : memref<1x4x512xf32, #tpu.memory_space<vmem>>, vector<1x4x384xf32>
    %12 = vector.shape_cast %11 : vector<1x4x384xf32> to vector<4x384xf32>
    %c24 = arith.constant 24 : index
    %c0_14 = arith.constant 0 : index
    %13 = vector.load %arg5[%c24, %c0_14] : memref<72x384xf32, #tpu.memory_space<vmem>>, vector<4x384xf32>
    tpu.vector_store %arg5[%c24, %c0_14], %12 {strides = array<i32>} : memref<72x384xf32, #tpu.memory_space<vmem>>, vector<4x384xf32>,
    %c0_15 = arith.constant 0 : index
    %c0_16 = arith.constant 0 : index
    %c19 = arith.constant 19 : index
    %14 = vector.load %arg2[%c0_15, %c0_16, %c19] : memref<1x4x512xf32, #tpu.memory_space<vmem>>, vector<1x4x384xf32>
    %15 = vector.shape_cast %14 : vector<1x4x384xf32> to vector<4x384xf32>
    %c32 = arith.constant 32 : index
    %c0_17 = arith.constant 0 : index
    %16 = vector.load %arg5[%c32, %c0_17] : memref<72x384xf32, #tpu.memory_space<vmem>>, vector<4x384xf32>
    tpu.vector_store %arg5[%c32, %c0_17], %15 {strides = array<i32>} : memref<72x384xf32, #tpu.memory_space<vmem>>, vector<4x384xf32>,
    %c0_18 = arith.constant 0 : index
    %c0_19 = arith.constant 0 : index
    %c20 = arith.constant 20 : index
    %17 = vector.load %arg2[%c0_18, %c0_19, %c20] : memref<1x4x512xf32, #tpu.memory_space<vmem>>, vector<1x4x384xf32>
    %18 = vector.shape_cast %17 : vector<1x4x384xf32> to vector<4x384xf32>
    %c40 = arith.constant 40 : index
    %c0_20 = arith.constant 0 : index
    %19 = vector.load %arg5[%c40, %c0_20] : memref<72x384xf32, #tpu.memory_space<vmem>>, vector<4x384xf32>
    tpu.vector_store %arg5[%c40, %c0_20], %18 {strides = array<i32>} : memref<72x384xf32, #tpu.memory_space<vmem>>, vector<4x384xf32>,
    %c0_21 = arith.constant 0 : index
    %c0_22 = arith.constant 0 : index
    %c36 = arith.constant 36 : index
    %20 = vector.load %arg2[%c0_21, %c0_22, %c36] : memref<1x4x512xf32, #tpu.memory_space<vmem>>, vector<1x4x384xf32>
    %21 = vector.shape_cast %20 : vector<1x4x384xf32> to vector<4x384xf32>
    %c48 = arith.constant 48 : index
    %c0_23 = arith.constant 0 : index
    %22 = vector.load %arg5[%c48, %c0_23] : memref<72x384xf32, #tpu.memory_space<vmem>>, vector<4x384xf32>
    tpu.vector_store %arg5[%c48, %c0_23], %21 {strides = array<i32>} : memref<72x384xf32, #tpu.memory_space<vmem>>, vector<4x384xf32>,
    %c0_24 = arith.constant 0 : index
    %c0_25 = arith.constant 0 : index
    %c37 = arith.constant 37 : index
    %23 = vector.load %arg2[%c0_24, %c0_25, %c37] : memref<1x4x512xf32, #tpu.memory_space<vmem>>, vector<1x4x384xf32>
    %24 = vector.shape_cast %23 : vector<1x4x384xf32> to vector<4x384xf32>
    %c56 = arith.constant 56 : index
    %c0_26 = arith.constant 0 : index
    %25 = vector.load %arg5[%c56, %c0_26] : memref<72x384xf32, #tpu.memory_space<vmem>>, vector<4x384xf32>
    tpu.vector_store %arg5[%c56, %c0_26], %24 {strides = array<i32>} : memref<72x384xf32, #tpu.memory_space<vmem>>, vector<4x384xf32>,
    %c0_27 = arith.constant 0 : index
    %c0_28 = arith.constant 0 : index
    %c38 = arith.constant 38 : index
    %26 = vector.load %arg2[%c0_27, %c0_28, %c38] : memref<1x4x512xf32, #tpu.memory_space<vmem>>, vector<1x4x384xf32>
    %27 = vector.shape_cast %26 : vector<1x4x384xf32> to vector<4x384xf32>
    %c64 = arith.constant 64 : index
    %c0_29 = arith.constant 0 : index
    %28 = vector.load %arg5[%c64, %c0_29] : memref<72x384xf32, #tpu.memory_space<vmem>>, vector<4x384xf32>
    tpu.vector_store %arg5[%c64, %c0_29], %27 {strides = array<i32>} : memref<72x384xf32, #tpu.memory_space<vmem>>, vector<4x384xf32>,
    %c0_30 = arith.constant 0 : index
    %c0_31 = arith.constant 0 : index
    %29 = vector.load %arg1[%c0_30, %c0_31] : memref<8x72xf32, #tpu.memory_space<vmem>>, vector<8x72xf32>
    %c0_32 = arith.constant 0 : index
    %c0_33 = arith.constant 0 : index
    %30 = vector.load %arg5[%c0_32, %c0_33] : memref<72x384xf32, #tpu.memory_space<vmem>>, vector<72x384xf32>
    %cst_34 = arith.constant dense<0.000000e+00> : vector<8x384xf32>
    %31 = tpu.matmul %29, %30, %cst_34 {dimension_numbers = #tpu.dot_dimension_numbers<[1], [0], [0], [1], [0, 0, 1, 1], [], []>} : vector<8x72xf32>, vector<72x384xf32>, vector<8x384xf32> -> vector<8x384xf32>
    %c0_35 = arith.constant 0 : index
    %c0_36 = arith.constant 0 : index
    %32 = vector.load %arg3[%c0_35, %c0_36] : memref<8x1xf32, #tpu.memory_space<vmem>>, vector<8x1xf32>
    %33 = vector.broadcast %32 : vector<8x1xf32> to vector<8x384xf32>
    %34 = arith.addf %31, %33 : vector<8x384xf32>
    %c0_37 = arith.constant 0 : index
    %c0_38 = arith.constant 0 : index
    %c0_39 = arith.constant 0 : index
    %35 = vector.load %arg4[%c0_37, %c0_38, %c0_39] : memref<1x8x384xf32, #tpu.memory_space<vmem>>, vector<1x8x384xf32>
    %36 = vector.shape_cast %35 : vector<1x8x384xf32> to vector<8x384xf32>
    %37 = vector.shape_cast %34 : vector<8x384xf32> to vector<1x8x384xf32>
    tpu.vector_store %arg4[%c0_37, %c0_38, %c0_39], %37 {strides = array<i32>} : memref<1x8x384xf32, #tpu.memory_space<vmem>>, vector<1x8x384xf32>,
    return
  }
  func.func @transform_0(%arg0: i32) -> (i32, i32) {
    %c0_i32 = arith.constant 0 : i32
    %c0_i32_0 = arith.constant 0 : i32
    %c0_i32_1 = arith.constant 0 : i32
    return %c0_i32, %c0_i32_0 : i32, i32
  }
  func.func @transform_1(%arg0: i32) -> (i32, i32, i32) {
    %c0_i32 = arith.constant 0 : i32
    %c0_i32_0 = arith.constant 0 : i32
    %c0_i32_1 = arith.constant 0 : i32
    return %arg0, %c0_i32, %c0_i32_0 : i32, i32, i32
  }
  func.func @transform_2(%arg0: i32) -> (i32, i32) {
    %c0_i32 = arith.constant 0 : i32
    %c0_i32_0 = arith.constant 0 : i32
    %c0_i32_1 = arith.constant 0 : i32
    return %c0_i32, %c0_i32_0 : i32, i32
  }
  func.func @transform_3(%arg0: i32) -> (i32, i32, i32) {
    %c0_i32 = arith.constant 0 : i32
    %c0_i32_0 = arith.constant 0 : i32
    %c0_i32_1 = arith.constant 0 : i32
    return %arg0, %c0_i32, %c0_i32_0 : i32, i32, i32
  }
}

</mosaic_0001>

<bundles_post_ra>
// kernel: tpu_custom_call.1
= control target key start
LH: loop header
LB: loop body
LE: loop exit
PB: predicated region body
PF: predicated region fallthrough
CT: control target
= control target key end

     0   :  { %8 = vsyncpa [#allocation4], 0  ;;  %s1130_s0 = inlined_call_operand.vmem [shape: f32[8,72], index: 0, kind: input, shape index: {}]   ;;  %s1131_s1 = inlined_call_operand.hbm [shape: f32[2,4,512], index: 1, kind: input, shape index: {}]   ;;  %s1132_s2 = inlined_call_operand.vmem [shape: f32[8,1], index: 2, kind: input, shape index: {}]   ;;  %s1133_s3 = inlined_call_operand.hbm [shape: f32[2,8,384], index: 3, kind: output, shape index: {}]  }
   0x1   :  { %10 = vsyncpa [#allocation4 + $0x1], 0 }
   0x2   :  { %11 = vsyncpa [#allocation5], 0 }
   0x3   :  { %13 = vsyncpa [#allocation5 + $0x1], 0  ;;  %s915_s12 = smov 0   ;;  %s917_s13 = smov 0  }
   0x4   :  { %s919_s14 = smov 0   ;;  %s921_s15 = smov 0  }
   0x5 LB: > { %s936_s16 = sadd.s32 4294967295, %s880_s15   ;;  %s681_s17 = sadd.s32 4294967294, %s880_s15   ;;  %s880_s15 = sphi %s921_s15, %s1150_s15   ;;  %s876_s14 = sphi %s919_s14, %s1149_s14   ;;  %s872_s13 = sphi %s917_s13, %s1148_s13   ;;  %s868_s12 = sphi %s915_s12, %s1147_s12  }
   0x6   : > { %s940_s18 = sadd.s32 1, %s880_s15   ;;  %s47_s19 = sadd.s32 1, %s876_s14 }
   0x7   : > { %s44_s20 = ssub.s32 %s880_s15, %s940_s18  ;;  %p54_p0 = scmp.ne.s32.totalorder %s876_s14, %s872_s13 }
   0x8   : > { %p45_p1 = scmp.eq.s32.totalorder %s44_s20, 0  ;;  %p55_p2 = scmp.eq.s32.totalorder %s880_s15, 0 }
   0x9   : > { %p60_p3 = scmp.ne.s32.totalorder %s872_s13, %s868_s12  ;;  %p61_p4 = scmp.eq.s32.totalorder %s936_s16, 0 }
   0xa   : > { %s952_s21 = scalar_select %p45_p1, %s876_s14, %s47_s19  }
   0xb   : > { %p954_p5 = por %p55_p2, %p54_p0  ;;  %p958_p6 = por %p61_p4, %p60_p3 }
   0xc   : > { %p105_p7 = scmp.eq.s32.totalorder %s936_s16, 1  ;;  %p111_p8 = scmp.eq.s32.totalorder %s681_s17, 1 }
   0xd   : > { %s1137_s23 = scalar_select %p958_p6, 1, 0 }
   0xe   : > { %p740_p10 = scmp.lt.s32.totalorder %s880_s15, 2  ;;  %p965_p11 = por %p105_p7, %p54_p0 }
   0xf   : > { %p969_p12 = por %p111_p8, %p60_p3  ;;  %s137_s26 = sand.u32 1, %s876_s14  }
  0x10   : > { %s1138_s24 = scalar_select %p965_p11, 1, 0 }
  0x11   : > { %s1139_s25 = scalar_select %p969_p12, 1, 0 }
  0x12   : > { %s694_s27 = sshll.u32 %s880_s15, 8  ;;  %s684_s28 = sshll.u32 %s137_s26, 4 }
  0x13   : > { %s978_s4 = scalar_lea.hbm %s1131_s1, %s694_s27  ;;  %s141_s5 = scalar_lea.vmem [#allocation3], %s684_s28 }
  0x14   : > { %s149_s6 = sshll.u32 %s141_s5, 4  ;;  %p982_p13 = pnand %p740_p10, %p954_p5  ;;  %s986_s6 = int_to_ptr.vmem [resolvable:$true] %s149_s6 }
  0x15   : > { %s138_s8 = scalar_lea.sflag [#allocation4], %s137_s26  ;;  %s788_s9 = scalar_lea.hbm %s978_s4, 256 }
  0x16   : > { %p789_p2 = scmp.ne.s32.totalorder %s978_s4, %s788_s9  ;;  %p790_p3 = pneg %p982_p13 }
  0x17   : > { %s793_s17 = scalar_lea.hbm %s1131_s1, 512  ;;  %p794_p5 = scmp.lt.s32.totalorder %s978_s4, %s1131_s1 }
  0x18   : > { %p791_p4 = pnand %p790_p3, %p789_p2  ;;  %p795_p8 = scmp.lt.s32.totalorder %s793_s17, %s788_s9 }
  0x1a   : > { %p792_p7 = pneg %p791_p4  ;;  %p796_p10 = por %p795_p8, %p794_p5 }
  0x1c   : > { %p797_p9 = pnand %p796_p10, %p792_p7 }
  0x1e   : > { %800 = shalt.err (!%p797_p9)
}
  0x1f   : > { %s801_s22 = scalar_lea.vmem %s986_s6, 256  ;;  %s882_s26 = smov [#allocation3]  }
  0x20   : > { %p802_p0 = scmp.ne.s32.totalorder %s986_s6, %s801_s22  ;;  %s806_s27 = sshll.u32 %s882_s26, 4  ;;  %s807_s27 = int_to_ptr.vmem [resolvable:$false] %s806_s27 }
  0x21   : > { %s808_s28 = scalar_lea.vmem %s807_s27, 512  ;;  %p809_p4 = scmp.lt.s32.totalorder %s986_s6, %s807_s27 }
  0x22   : > { %p804_p1 = pnand %p802_p0, %p790_p3  ;;  %p810_p12 = scmp.lt.s32.totalorder %s808_s28, %s801_s22 }
  0x24   : > { %p805_p2 = pneg %p804_p1  ;;  %p811_p11 = por %p810_p12, %p809_p4 }
  0x26   : > { %p812_p6 = pnand %p811_p11, %p805_p2 }
  0x28   : > { %815 = shalt.err (!%p812_p6)
}
  0x29   : > { %735 = dma.hbm_to_vmem [thread:$0]  (!%p982_p13), %s978_s4, 256, %s986_s6, %s138_s8  }
  0x2a   : > { %p1141_p9 = scmp.lt.s32.totalorder %s880_s15, 3  ;;  %p1142_p7 = scmp.ge.s32.totalorder %s880_s15, 1 }
  0x2c   : > { %p155_p0 = pnand %p1142_p7, %p1141_p9 }
  0x2d   : > { %s1013_s29 = sand.u32 (!%p155_p0), 1, %s872_s13   ;;  %p1143_p6 = scmp.ne.s32.totalorder (!%p155_p0), %s1137_s23, 0 }
  0x2e   : > { %158 = sbr.rel (%p155_p0) target bundleno = 451 (0x1c3), region = 32  ;;  %s688_s30 = sshll.u32 (!%p155_p0), %s1013_s29, 4 }
  0x2f   : > { %s161_s5 = scalar_lea.sflag (!%p155_p0), [#allocation4], %s1013_s29  ;;  %s1017_s9 = scalar_lea.vmem (!%p155_p0), [#allocation3], %s688_s30 }
  0x33   : > { %859 = dma.done.wait (%p1143_p6), %s161_s5, 256  }
  0x34   : > { %861 = vsyncadd (%p1143_p6), %s161_s5, 4294967040  ;;  %v883_v0 = vmov 0.0   ;;  %v391_v1 = vld [vmem:[%s1017_s9 + $0x8] sm:$0xff]  ;;  %v390_v2 = vld [vmem:[%s1017_s9] sm:$0xff]  ;;  %s884_s23 = smov 90   ;;  %s885_s4 = smov 91  }
  0x35   : > { %211 = vst [vmem:[#allocation2 + $0xd0] sm:$0xff] %v883_v0  ;;  %212 = vst [vmem:[#allocation2 + $0xc0] sm:$0xff] %v883_v0  ;;  %705 = vmatprep.subr.mxu1 %v883_v0  ;;  %516 = vmatprep.mubr.f32.mxu0 %v883_v0  ;;  %v394_v3 = vcombine.high %v390_v2, %v390_v2  ;;  %v395_v4 = vcombine.high %v391_v1, %v391_v1  ;;  %s886_s6 = smov 92   ;;  %s887_s7 = smov 108   ;;  %v215_v5 = vld [vmem:[%s1017_s9 + $0x8] sm:$0xf] }
  0x36   : > { %187 = vst [vmem:[#allocation2 + $0xb0] sm:$0xff] %v883_v0  ;;  %188 = vst [vmem:[#allocation2] sm:$0xff] %v883_v0  ;;  %400 = vrot.lane.b32.xlu0 %v391_v1, %s884_s23  ;;  %396 = vrot.lane.b32.xlu1 %v390_v2, %s884_s23  ;;  %s888_s8 = smov 109   ;;  %s889_s10 = smov 110   ;;  %vm892_vm0 = vmmov 0   ;;  %v442_v6 = vld [vmem:[%s1132_s2] sm:$0xff] }
  0x37   : > { %189 = vst [vmem:[#allocation2 + $0x10] sm:$0xff] %v883_v0  ;;  %190 = vst [vmem:[#allocation2 + $0x48] sm:$0xff] %v883_v0  ;;  %s890_s11 = smov 126   ;;  %s891_s17 = smov 127   ;;  %723 = vmatprep.mubr.msk.f32.mxu1 %vm892_vm0, %v883_v0  ;;  %v893_v7 = vmov 0   ;;  %vm404_vm1 = vcmask 736256  }
  0x38   : > { %191 = vst [vmem:[#allocation2 + $0x60] sm:$0xff] %v883_v0  ;;  %192 = vst [vmem:[#allocation2 + $0x28] sm:$0xff] %v883_v0  ;;  %785 = vset.pattern.permute.xlu0 %v893_v7  ;;  %vm380_vm2 = vcmask 744448   ;;  %vm356_vm3 = vcmask 752640   ;;  %vm332_vm4 = vcmask 883712   ;;  %vm308_vm5 = vcmask 891904  }
  0x39   : > { %193 = vst [vmem:[#allocation2 + $0x40] sm:$0xff] %v883_v0  ;;  %194 = vst [vmem:[#allocation2 + $0x78] sm:$0xff] %v883_v0  ;;  %vm284_vm6 = vcmask 900096   ;;  %vm260_vm7 = vcmask 1031168   ;;  %vm236_vm8 = vcmask 1039360   ;;  %vm448_vm9 = vcmask 588800  }
  0x3a   : > { %195 = vst [vmem:[#allocation2 + $0x80] sm:$0xff] %v883_v0  ;;  %196 = vst [vmem:[#allocation2 + $0xa8] sm:$0xff] %v883_v0  ;;  %376 = vrot.lane.b32.xlu0 %v391_v1, %s885_s4  ;;  %372 = vrot.lane.b32.xlu1 %v390_v2, %s885_s4  ;;  %s726_s27 = smul.u32 24, %s1013_s29  ;;  %p1144_p12 = scmp.ne.s32.totalorder %s1138_s24, 0 }
  0x3b   : > { %197 = vst [vmem:[#allocation2 + $0x50] sm:$0xff] %v883_v0  ;;  %198 = vst [vmem:[#allocation2 + $0x30] sm:$0xff] %v883_v0  ;;  %s727_s28 = smul.u32 384, %s936_s16  ;;  %s894_s16 = smov [#allocation6]  }
  0x3c   : > { %199 = vst [vmem:[#allocation2 + $0x88] sm:$0xff] %v883_v0  ;;  %200 = vst [vmem:[#allocation2 + $0x70] sm:$0xff] %v883_v0  ;;  %s186_s30 = scalar_lea.vmem [#allocation6], %s726_s27 }
  0x3d   : > { %201 = vst [vmem:[#allocation2 + $0x8] sm:$0xff] %v883_v0  ;;  %202 = vst [vmem:[#allocation2 + $0x38] sm:$0xff] %v883_v0  ;;  %s611_s5 = sshll.u32 %s186_s30, 4  ;;  %s612_s5 = int_to_ptr.vmem [resolvable:$true] %s611_s5 }
  0x3e   : > { %203 = vst [vmem:[#allocation2 + $0x20] sm:$0xff] %v883_v0  ;;  %204 = vst [vmem:[#allocation2 + $0xb8] sm:$0xff] %v883_v0  ;;  %398 = vrot.lane.b32.xlu0 %v394_v3, %s884_s23  ;;  %374 = vrot.lane.b32.xlu1 %v394_v3, %s885_s4 }
  0x3f   : > { %205 = vst [vmem:[#allocation2 + $0x58] sm:$0xff] %v883_v0  ;;  %206 = vst [vmem:[#allocation2 + $0xc8] sm:$0xff] %v883_v0 }
  0x40   : > { %207 = vst [vmem:[#allocation2 + $0xa0] sm:$0xff] %v883_v0  ;;  %208 = vst [vmem:[#allocation2 + $0x90] sm:$0xff] %v883_v0 }
  0x41   : > { %209 = vst [vmem:[#allocation2 + $0x98] sm:$0xff] %v883_v0  ;;  %210 = vst [vmem:[#allocation2 + $0x18] sm:$0xff] %v883_v0 }
  0x42   : > { %213 = vst [vmem:[#allocation2 + $0x68] sm:$0xff] %v883_v0  ;;  %219 = vst [vmem:[#allocation2 + $0xb0] sm:$0xf] %v390_v2  ;;  %402 = vrot.lane.b32.xlu0 %v395_v4, %s884_s23  ;;  %350 = vrot.lane.b32.xlu1 %v394_v3, %s886_s6 }
  0x43   : > { %220 = vst [vmem:[#allocation2] sm:$0xf] %v394_v3  ;;  %221 = vst [vmem:[#allocation2 + $0x10] sm:$0xf] %v215_v5 }
  0x46   : > { %352 = vrot.lane.b32.xlu0 %v391_v1, %s886_s6  ;;  %348 = vrot.lane.b32.xlu1 %v390_v2, %s886_s6 }
  0x4a   : > { %378 = vrot.lane.b32.xlu0 %v395_v4, %s885_s4  ;;  %326 = vrot.lane.b32.xlu1 %v394_v3, %s887_s7  ;;  %s1093_s4 = scalar_lea.hbm %s1133_s3, %s727_s28 }
  0x4e   : > { %328 = vrot.lane.b32.xlu0 %v391_v1, %s887_s7  ;;  %324 = vrot.lane.b32.xlu1 %v390_v2, %s887_s7 }
  0x52   : > { %354 = vrot.lane.b32.xlu0 %v395_v4, %s886_s6  ;;  %302 = vrot.lane.b32.xlu1 %v394_v3, %s888_s8  ;;  %s597_s6 = scalar_lea.sflag [#allocation5], %s1013_s29 }
  0x56   : > { %304 = vrot.lane.b32.xlu0 %v391_v1, %s888_s8  ;;  %300 = vrot.lane.b32.xlu1 %v390_v2, %s888_s8 }
  0x5a   : > { %330 = vrot.lane.b32.xlu0 %v395_v4, %s887_s7  ;;  %278 = vrot.lane.b32.xlu1 %v394_v3, %s889_s10  ;;  %s816_s7 = scalar_lea.vmem %s612_s5, 384 }
  0x5b   : > { %p817_p11 = scmp.ne.s32.totalorder %s612_s5, %s816_s7 }
  0x5d   : > { %p818_p13 = pnand %p817_p11, %p1144_p12 }
  0x5e   : > { %280 = vrot.lane.b32.xlu0 %v391_v1, %s889_s10  ;;  %276 = vrot.lane.b32.xlu1 %v390_v2, %s889_s10 }
  0x5f   : > { %p819_p1 = pneg %p818_p13 }
  0x62   : > { %306 = vrot.lane.b32.xlu0 %v395_v4, %s888_s8  ;;  %254 = vrot.lane.b32.xlu1 %v394_v3, %s890_s11  ;;  %s820_s8 = sshll.u32 %s894_s16, 4  ;;  %s821_s8 = int_to_ptr.vmem [resolvable:$false] %s820_s8 }
  0x63   : > { %p823_p3 = scmp.lt.s32.totalorder %s612_s5, %s821_s8 }
  0x66   : > { %256 = vrot.lane.b32.xlu0 %v391_v1, %s890_s11  ;;  %252 = vrot.lane.b32.xlu1 %v390_v2, %s890_s11 }
  0x6a   : > { %282 = vrot.lane.b32.xlu0 %v395_v4, %s889_s10  ;;  %230 = vrot.lane.b32.xlu1 %v394_v3, %s891_s17  ;;  %s822_s10 = scalar_lea.vmem %s821_s8, 768 }
  0x6b   : > { %p824_p5 = scmp.lt.s32.totalorder %s822_s10, %s816_s7 }
  0x6d   : > { %p825_p8 = por %p824_p5, %p823_p3 }
  0x6e   : > { %232 = vrot.lane.b32.xlu0 %v391_v1, %s891_s17  ;;  %228 = vrot.lane.b32.xlu1 %v390_v2, %s891_s17 }
  0x6f   : > { %p826_p10 = pnand %p825_p8, %p819_p1 }
  0x72   : > { %258 = vrot.lane.b32.xlu0 %v395_v4, %s890_s11  ;;  %234 = vrot.lane.b32.xlu1 %v395_v4, %s891_s17 }
  0x76   : > { %445 = vperm.xlu0 %785, %v442_v6  }
  0xa8   : > { %v401_v8 = vpop.permute.xlu0 %400  ;;  %v397_v9 = vpop.permute.xlu1 %396 }
  0xac   : > { %v377_v10 = vpop.permute.xlu0 %376  ;;  %v373_v11 = vpop.permute.xlu1 %372 }
  0xb0   : > { %v399_v12 = vpop.permute.xlu0 %398  ;;  %v375_v13 = vpop.permute.xlu1 %374 }
  0xb1   : > { %v405_v14 = vsel %vm404_vm1, %v397_v9, %v399_v12  ;;  %v406_v15 = vsel %vm404_vm1, %v399_v12, %v401_v8  ;;  %v381_v16 = vsel %vm380_vm2, %v373_v11, %v375_v13  ;;  %v382_v17 = vsel %vm380_vm2, %v375_v13, %v377_v10 }
  0xb2   : > { %411 = vst [vmem:[#allocation2 + $0xd0] sm:$0xf] %v405_v14  ;;  %412 = vst [vmem:[#allocation2 + $0xc0] sm:$0xf] %v406_v15 }
  0xb3   : > { %387 = vst [vmem:[#allocation2 + $0x90] sm:$0xf] %v381_v16  ;;  %388 = vst [vmem:[#allocation2 + $0x98] sm:$0xf] %v382_v17 }
  0xb4   : > { %v403_v18 = vpop.permute.xlu0 %402  ;;  %v351_v19 = vpop.permute.xlu1 %350 }
  0xb5   : > { %v407_v20 = vsel %vm404_vm1, %v401_v8, %v403_v18 }
  0xb6   : > { %413 = vst [vmem:[#allocation2 + $0x68] sm:$0xf] %v407_v20 }
  0xb8   : > { %v353_v21 = vpop.permute.xlu0 %352  ;;  %v349_v22 = vpop.permute.xlu1 %348 }
  0xb9   : > { %v358_v23 = vsel %vm356_vm3, %v351_v19, %v353_v21  ;;  %v357_v24 = vsel %vm356_vm3, %v349_v22, %v351_v19  ;;  %v440_v25 = vld [vmem:[#allocation2 + $0xc0] sm:$0xff]  ;;  %v439_v26 = vld [vmem:[#allocation2 + $0xd0] sm:$0xff] }
  0xba   : > { %364 = vst [vmem:[#allocation2 + $0xc8] sm:$0xf] %v358_v23  ;;  %363 = vst [vmem:[#allocation2 + $0x58] sm:$0xf] %v357_v24  ;;  %466 = vmatprep.subr.mxu0 %v440_v25  ;;  %v437_v27 = vld [vmem:[#allocation2 + $0x98] sm:$0xff]  ;;  %v436_v30 = vld [vmem:[#allocation2 + $0x90] sm:$0xff] }
  0xbb   : > { %467 = vmatpush1.msra.mxu0 %v439_v26  ;;  %v416_v23 = vld [vmem:[#allocation2] sm:$0xff]  ;;  %v415_v24 = vld [vmem:[#allocation2 + $0xb0] sm:$0xff] }
  0xbc   : > { %v379_v28 = vpop.permute.xlu0 %378  ;;  %v327_v29 = vpop.permute.xlu1 %326  ;;  %468 = vmatprep.subr.mxu0 %v437_v27  ;;  %v414_v25 = vld [vmem:[%s1130_s0] sm:$0xff] }
  0xbd   : > { %v383_v31 = vsel %vm380_vm2, %v377_v10, %v379_v28  ;;  %469 = vmatpush1.msra.mxu0 %v436_v30  ;;  %v441_v32 = vld [vmem:[#allocation2 + $0x68] sm:$0xff]  ;;  %v417_v28 = vld [vmem:[#allocation2 + $0x10] sm:$0xff] }
  0xbe   : > { %389 = vst [vmem:[#allocation2 + $0x18] sm:$0xf] %v383_v31  ;;  %706 = vmatpush3.msra.mxu1 %v441_v32 }
  0xbf   : > { %707 = vmatprep.subr.mxu1 %v883_v0 }
  0xc0   : > { %v329_v33 = vpop.permute.xlu0 %328  ;;  %v325_v34 = vpop.permute.xlu1 %324 }
  0xc1   : > { %v334_v35 = vsel %vm332_vm4, %v327_v29, %v329_v33  ;;  %v333_v36 = vsel %vm332_vm4, %v325_v34, %v327_v29  ;;  %v434_v37 = vld [vmem:[#allocation2 + $0xc8] sm:$0xff]  ;;  %v433_v38 = vld [vmem:[#allocation2 + $0x58] sm:$0xff] }
  0xc2   : > { %340 = vst [vmem:[#allocation2 + $0x20] sm:$0xf] %v334_v35  ;;  %339 = vst [vmem:[#allocation2 + $0x38] sm:$0xf] %v333_v36  ;;  %470 = vmatprep.subr.mxu0 %v434_v37 }
  0xc3   : > { %471 = vmatpush1.msra.mxu0 %v433_v38 }
  0xc4   : > { %v355_v39 = vpop.permute.xlu0 %354  ;;  %v303_v40 = vpop.permute.xlu1 %302 }
  0xc5   : > { %v359_v41 = vsel %vm356_vm3, %v353_v21, %v355_v39  ;;  %v438_v42 = vld [vmem:[#allocation2 + $0x18] sm:$0xff] }
  0xc6   : > { %365 = vst [vmem:[#allocation2 + $0xa0] sm:$0xf] %v359_v41  ;;  %708 = vmatpush3.msra.mxu1 %v438_v42 }
  0xc7   : > { %709 = vmatprep.subr.mxu1 %v883_v0 }
  0xc8   : > { %v305_v43 = vpop.permute.xlu0 %304  ;;  %v301_v44 = vpop.permute.xlu1 %300 }
  0xc9   : > { %v310_v45 = vsel %vm308_vm5, %v303_v40, %v305_v43  ;;  %v309_v46 = vsel %vm308_vm5, %v301_v44, %v303_v40  ;;  %v431_v47 = vld [vmem:[#allocation2 + $0x20] sm:$0xff]  ;;  %v430_v48 = vld [vmem:[#allocation2 + $0x38] sm:$0xff] }
  0xca   : > { %316 = vst [vmem:[#allocation2 + $0x70] sm:$0xf] %v310_v45  ;;  %315 = vst [vmem:[#allocation2 + $0x88] sm:$0xf] %v309_v46  ;;  %472 = vmatprep.subr.mxu0 %v431_v47 }
  0xcb   : > { %473 = vmatpush1.msra.mxu0 %v430_v48 }
  0xcc   : > { %v331_v49 = vpop.permute.xlu0 %330  ;;  %v279_v50 = vpop.permute.xlu1 %278 }
  0xcd   : > { %v335_v51 = vsel %vm332_vm4, %v329_v33, %v331_v49  ;;  %v435_v52 = vld [vmem:[#allocation2 + $0xa0] sm:$0xff] }
  0xce   : > { %341 = vst [vmem:[#allocation2 + $0xb8] sm:$0xf] %v335_v51  ;;  %710 = vmatpush3.msra.mxu1 %v435_v52 }
  0xcf   : > { %711 = vmatprep.subr.mxu1 %v883_v0 }
  0xd0   : > { %v281_v53 = vpop.permute.xlu0 %280  ;;  %v277_v54 = vpop.permute.xlu1 %276 }
  0xd1   : > { %v286_v55 = vsel %vm284_vm6, %v279_v50, %v281_v53  ;;  %v285_v56 = vsel %vm284_vm6, %v277_v54, %v279_v50  ;;  %v428_v57 = vld [vmem:[#allocation2 + $0x70] sm:$0xff]  ;;  %v427_v58 = vld [vmem:[#allocation2 + $0x88] sm:$0xff] }
  0xd2   : > { %292 = vst [vmem:[#allocation2 + $0x50] sm:$0xf] %v286_v55  ;;  %291 = vst [vmem:[#allocation2 + $0xa8] sm:$0xf] %v285_v56  ;;  %474 = vmatprep.subr.mxu0 %v428_v57 }
  0xd3   : > { %475 = vmatpush1.msra.mxu0 %v427_v58 }
  0xd4   : > { %v307_v59 = vpop.permute.xlu0 %306  ;;  %v255_v60 = vpop.permute.xlu1 %254 }
  0xd5   : > { %v311_v61 = vsel %vm308_vm5, %v305_v43, %v307_v59  ;;  %v432_v62 = vld [vmem:[#allocation2 + $0xb8] sm:$0xff] }
  0xd6   : > { %317 = vst [vmem:[#allocation2 + $0x8] sm:$0xf] %v311_v61  ;;  %712 = vmatpush3.msra.mxu1 %v432_v62 }
  0xd7   : > { %713 = vmatprep.subr.mxu1 %v883_v0 }
  0xd8   : > { %v257_v63 = vpop.permute.xlu0 %256  ;;  %v253_v1 = vpop.permute.xlu1 %252 }
  0xd9   : > { %v262_v2 = vsel %vm260_vm7, %v255_v60, %v257_v63  ;;  %v261_v3 = vsel %vm260_vm7, %v253_v1, %v255_v60  ;;  %v425_v4 = vld [vmem:[#allocation2 + $0x50] sm:$0xff]  ;;  %v424_v5 = vld [vmem:[#allocation2 + $0xa8] sm:$0xff] }
  0xda   : > { %268 = vst [vmem:[#allocation2 + $0x78] sm:$0xf] %v262_v2  ;;  %267 = vst [vmem:[#allocation2 + $0x40] sm:$0xf] %v261_v3  ;;  %476 = vmatprep.subr.mxu0 %v425_v4 }
  0xdb   : > { %477 = vmatpush1.msra.mxu0 %v424_v5 }
  0xdc   : > { %v283_v6 = vpop.permute.xlu0 %282  ;;  %v231_v7 = vpop.permute.xlu1 %230 }
  0xdd   : > { %v287_v8 = vsel %vm284_vm6, %v281_v53, %v283_v6  ;;  %v429_v9 = vld [vmem:[#allocation2 + $0x8] sm:$0xff] }
  0xde   : > { %293 = vst [vmem:[#allocation2 + $0x30] sm:$0xf] %v287_v8  ;;  %714 = vmatpush3.msra.mxu1 %v429_v9 }
  0xdf   : > { %715 = vmatprep.subr.mxu1 %v883_v0 }
  0xe0   : > { %v233_v10 = vpop.permute.xlu0 %232  ;;  %v229_v11 = vpop.permute.xlu1 %228 }
  0xe1   : > { %v238_v12 = vsel %vm236_vm8, %v231_v7, %v233_v10  ;;  %v237_v13 = vsel %vm236_vm8, %v229_v11, %v231_v7  ;;  %v422_v14 = vld [vmem:[#allocation2 + $0x78] sm:$0xff]  ;;  %v421_v15 = vld [vmem:[#allocation2 + $0x40] sm:$0xff] }
  0xe2   : > { %244 = vst [vmem:[#allocation2 + $0x60] sm:$0xf] %v238_v12  ;;  %243 = vst [vmem:[#allocation2 + $0x48] sm:$0xf] %v237_v13  ;;  %478 = vmatprep.subr.mxu0 %v422_v14 }
  0xe3   : > { %479 = vmatpush1.msra.mxu0 %v421_v15 }
  0xe4   : > { %v259_v16 = vpop.permute.xlu0 %258  ;;  %v235_v17 = vpop.permute.xlu1 %234 }
  0xe5   : > { %v263_v18 = vsel %vm260_vm7, %v257_v63, %v259_v16  ;;  %v239_v19 = vsel %vm236_vm8, %v233_v10, %v235_v17  ;;  %v426_v20 = vld [vmem:[#allocation2 + $0x30] sm:$0xff] }
  0xe6   : > { %269 = vst [vmem:[#allocation2 + $0x80] sm:$0xf] %v263_v18  ;;  %245 = vst [vmem:[#allocation2 + $0x28] sm:$0xf] %v239_v19  ;;  %716 = vmatpush3.msra.mxu1 %v426_v20 }
  0xe7   : > { %717 = vmatprep.subr.mxu1 %v883_v0 }
  0xe9   : > { %v419_v21 = vld [vmem:[#allocation2 + $0x60] sm:$0xff]  ;;  %v418_v22 = vld [vmem:[#allocation2 + $0x48] sm:$0xff] }
  0xea   : > { %480 = vmatprep.subr.mxu0 %v419_v21 }
  0xeb   : > { %481 = vmatpush1.msra.mxu0 %v418_v22 }
  0xec   : > { %482 = vmatprep.subr.mxu0 %v416_v23 }
  0xed   : > { %483 = vmatpush1.msra.mxu0 %v415_v24  ;;  %v423_v26 = vld [vmem:[#allocation2 + $0x80] sm:$0xff]  ;;  %v420_v27 = vld [vmem:[#allocation2 + $0x28] sm:$0xff] }
  0xee   : > { %718 = vmatpush3.msra.mxu1 %v423_v26  ;;  %689 = vmatmul.mubr.msk.f32.vlgmr.msra.gmra.mxu0 %vm448_vm9, %v414_v25 }
  0xef   : > { %719 = vmatprep.subr.mxu1 %v883_v0 }
  0xf0   : > { %720 = vmatpush3.msra.mxu1 %v420_v27 }
  0xf1   : > { %721 = vmatprep.subr.mxu1 %v883_v0  ;;  %v446_v29 = vpop.permute.xlu0 %445 }
  0xf2   : > { %722 = vmatpush3.msra.mxu1 %v417_v28 }
  0xf3   : > { %724 = vmatmul.mubr.msk.f32.vlgmr.msra.gmra.mxu1 %vm448_vm9, %v414_v25 }
 0x1ae   : > { %v518_v30 = vpop.f32.mrf.mxu0 }
 0x1af   : > { %v519_v31 = vadd.f32 %v518_v30, %v446_v29 }
 0x1b0   : > { %v520_v32 = vpop.f32.mrf.mxu0 }
 0x1b1   : > { %593 = vst [vmem:[%s186_s30] sm:$0xff] %v519_v31  ;;  %v521_v33 = vadd.f32 %v520_v32, %v446_v29 }
 0x1b3   : > { %594 = vst [vmem:[%s186_s30 + $0x8] sm:$0xff] %v521_v33  ;;  %v589_v34 = vpop.f32.mrf.mxu1 }
 0x1b4   : > { %v590_v35 = vadd.f32 %v589_v34, %v446_v29 }
 0x1b5   : > { %v725_v0 = vpop.f32.mrf.mxu1 }
 0x1b6   : > { %595 = vst [vmem:[%s186_s30 + $0x10] sm:$0xff] %v590_v35 }
 0x1b7   : > { %829 = shalt.err (!%p826_p10)
}
 0x1b8   : > { %s830_s11 = scalar_lea.hbm %s1093_s4, 384  ;;  %s834_s19 = scalar_lea.hbm %s1133_s3, 768 }
 0x1b9   : > { %p831_p2 = scmp.ne.s32.totalorder %s1093_s4, %s830_s11  ;;  %p835_p7 = scmp.lt.s32.totalorder %s1093_s4, %s1133_s3 }
 0x1ba   : > { %p836_p0 = scmp.lt.s32.totalorder %s834_s19, %s830_s11 }
 0x1bb   : > { %p832_p4 = pnand %p831_p2, %p1144_p12 }
 0x1bc   : > { %p837_p6 = por %p836_p0, %p835_p7 }
 0x1bd   : > { %p833_p9 = pneg %p832_p4 }
 0x1bf   : > { %p838_p11 = pnand %p837_p6, %p833_p9 }
 0x1c1   : > { %841 = shalt.err (!%p838_p11)
}
 0x1c2   : > { %730 = dma.vmem_to_hbm [thread:$0]  (%p1144_p12), %s612_s5, 384, %s1093_s4, %s597_s6  }
 0x1c3 PF: > { %s623_s26 = sand.u32 1, %s868_s12   ;;  %p1145_p13 = scmp.ne.s32.totalorder %s1139_s25, 0 }
 0x1c4   : > { %p1146_p1 = scmp.ge.s32.totalorder %s880_s15, 2  ;;  %s624_s27 = scalar_lea.sflag [#allocation5], %s623_s26 }
 0x1c6   : > { %p737_p3 = pnand %p1146_p1, %p1145_p13 }
 0x1c8   : > { %p738_p5 = pneg %p737_p3 }
 0x1ca   : > { %863 = dma.done.wait (%p738_p5), %s624_s27, 384  }
 0x1cb   : > { %865 = vsyncadd (%p738_p5), %s624_s27, 4294966912  ;;  %p16_p8 = scmp.ge.s32.totalorder %s940_s18, 4   ;;  %s1147_s12 = smov %s872_s13 }
 0x1cc   : > { %s1148_s13 = smov %s876_s14  ;;  %s1149_s14 = smov %s952_s21 }
 0x1cd   : > { %s1150_s15 = smov %s940_s18  ;;  %18 = sbr.rel (!%p16_p8) target bundleno = 5 (0x5), region = 77 }
 0x1d2   :  { %629 = vsyncpa [#allocation4], 1 }
 0x1d3   :  { %631 = vsyncpa [#allocation4 + $0x1], 1 }
 0x1d4   :  { %632 = vsyncpa [#allocation5], 1 }
 0x1d5   :  { %634 = vsyncpa [#allocation5 + $0x1], 1 }

</bundles_post_ra>
